<compile_context>
chip_gen: v6e
topology: v6e:2x2x1
jax: 0.10.0
libtpu: 0.0.40
codegen_flags: <defaults>
</compile_context>

<pallas_src>
import jax
import jax.numpy as jnp
from jax.experimental import pallas as pl
from jax.experimental.pallas import tpu as pltpu

LANES = 128
SUBLANES = 8
TARGET_BLOCK_BYTES = 2 << 20          # ~2 MiB per block, regardless of dtype
SMALL_INPUT_BYTES = 4 << 20           # below this, let XLA fuse the multiply


def _round_up(x: int, m: int) -> int:
    return ((x + m - 1) // m) * m


def _num_tensorcores() -> int:
    """Best-effort TensorCores-per-device (v7x / v4 / v5p expose 2)."""
    try:
        d = jax.devices()[0]
        if d.platform != "tpu":
            return 1
        kind = (getattr(d, "device_kind", "") or "").lower()
        if "v7" in kind or "7x" in kind or "v4" in kind or "v5p" in kind:
            return 2
        return 1
    except Exception:
        return 1


def _scale_kernel(scale_ref, x_ref, o_ref):
    # scale_ref: SMEM (1,) f32 ; x_ref / o_ref: VMEM (tile_rows, 128) native dtype.
    # f32 compute (no-op for f32 inputs); the op is DMA-bound so the cast hides
    # under the copy on every generation (and v5e's VPU has no bf16 anyway).
    o_ref[...] = (x_ref[...].astype(jnp.float32) * scale_ref[0]).astype(o_ref.dtype)


def _pallas_scale_2d(x2d: jax.Array, scale: jax.Array,
                     tile_rows: int | None = None,
                     donate: bool = False) -> jax.Array:
    rows, lanes = x2d.shape
    itemsize = jnp.dtype(x2d.dtype).itemsize

    if tile_rows is not None:
        # Explicit override (testing / tuning): only enforce legality.
        tile_rows = max(SUBLANES, _round_up(int(tile_rows), SUBLANES))
        tile_rows = min(tile_rows, _round_up(rows, SUBLANES))
    else:
        # Byte-constant tile: ~2 MiB per block for any dtype.
        tile_rows = _round_up(max(TARGET_BLOCK_BYTES // (lanes * itemsize), SUBLANES),
                              SUBLANES)
        tile_rows = min(tile_rows, _round_up(rows, SUBLANES))

        # Multi-TensorCore parts: guarantee >= 2*cores blocks and (best effort)
        # a grid count that is a multiple of the core count, so the "parallel"
        # axis splits evenly. Single-TC parts keep one large block.
        cores = _num_tensorcores()
        if cores > 1:
            min_blocks = 2 * cores
            if rows >= min_blocks * SUBLANES:
                tile_rows = min(tile_rows,
                                _round_up(pl.cdiv(rows, min_blocks), SUBLANES))
            g = pl.cdiv(rows, tile_rows)
            if g % cores != 0 and rows > SUBLANES:
                g = _round_up(g, cores)
                tile_rows = max(SUBLANES, _round_up(pl.cdiv(rows, g), SUBLANES))

    grid = (pl.cdiv(rows, tile_rows),)
    n = rows * lanes
    cost = pl.CostEstimate(flops=n, transcendentals=0,
                           bytes_accessed=2 * n * itemsize + 4)

    return pl.pallas_call(
        _scale_kernel,
        out_shape=jax.ShapeDtypeStruct((rows, lanes), x2d.dtype),
        grid_spec=pltpu.PrefetchScalarGridSpec(
            num_scalar_prefetch=0,
            grid=grid,
            in_specs=[
                pl.BlockSpec(memory_space=pltpu.MemorySpace.SMEM),   # scale (1,) f32
                pl.BlockSpec((tile_rows, lanes), lambda i: (i, 0)),  # x tile
            ],
            out_specs=pl.BlockSpec((tile_rows, lanes), lambda i: (i, 0)),
        ),
        compiler_params=pltpu.CompilerParams(
            dimension_semantics=("parallel",),
        ),
        cost_estimate=cost,
        input_output_aliases={1: 0} if donate else {},
    )(scale.astype(jnp.float32), x2d)


def scale_layer(
    x: jax.Array,
    scale: jax.Array,
    *,
    tile_rows: int | None = None,
    small_input_bytes: int = SMALL_INPUT_BYTES,
    force_pallas: bool = False,
    donate: bool = False,
) -> jax.Array:
    """out = x * scale (learnable scalar parameter of shape (1,))."""
    orig_shape = x.shape
    orig_dtype = x.dtype
    n = x.size

    s32 = scale.astype(jnp.float32)[0]

    # Non-float inputs: standard promotion (matches PyTorch int * float param).
    if not jnp.issubdtype(orig_dtype, jnp.floating):
        return x * s32

    # Empty input: nothing to scale; preserve shape/dtype.
    if n == 0:
        return x

    nbytes = n * jnp.dtype(orig_dtype).itemsize

    # Ragged tail: pad+slice would triple HBM traffic; the fused XLA multiply
    # is already at the bandwidth roofline for this pattern.
    if n % LANES != 0:
        return (x.astype(jnp.float32) * s32).astype(orig_dtype)

    # Small inputs: XLA fuses the scalar multiply into neighbors for free.
    if not force_pallas and nbytes < small_input_bytes:
        return (x.astype(jnp.float32) * s32).astype(orig_dtype)

    rows = n // LANES
    out2d = _pallas_scale_2d(x.reshape(rows, LANES), scale,
                             tile_rows=tile_rows, donate=donate)
    return out2d.reshape(orig_shape)


if __name__ == "__main__":
    key = jax.random.PRNGKey(0)
    # NCHW, small demo shape
    x = jax.random.normal(key, (2, 4, 16, 16), dtype=jnp.float32)

    # deterministic parameter init, matching nn.Parameter(torch.FloatTensor([0.001]))
    init_value = 0.001
    scale = jnp.array([init_value], dtype=jnp.float32)
    ref = x * scale[0]

    # Forced Pallas path so the kernel is exercised even at demo size.
    out = jax.block_until_ready(scale_layer(x, scale, force_pallas=True))
    assert out.shape == x.shape and out.dtype == x.dtype
    assert jnp.allclose(out, ref, atol=1e-6, rtol=1e-6)

    # Auto-dispatch path (small input -> fused XLA multiply).
    out_auto = jax.block_until_ready(scale_layer(x, scale))
    assert jnp.allclose(out_auto, ref, atol=1e-6, rtol=1e-6)

    # bf16 native-dtype streaming path (f32 compute inside the kernel).
    xb = x.astype(jnp.bfloat16)
    out_b = jax.block_until_ready(scale_layer(xb, scale, force_pallas=True))
    ref_b = (xb.astype(jnp.float32) * scale[0]).astype(jnp.bfloat16)
    assert out_b.dtype == jnp.bfloat16
    assert jnp.allclose(out_b.astype(jnp.float32), ref_b.astype(jnp.float32),
                        atol=1e-2, rtol=1e-2)

    # Partial-last-block path: 96 rows with a forced 40-row tile -> grid of 3,
    # last block masked.
    x2 = jax.random.normal(jax.random.PRNGKey(1), (2, 4, 16, 24), dtype=jnp.float32)
    out2 = jax.block_until_ready(scale_layer(x2, scale, force_pallas=True,
                                             tile_rows=40))
    assert jnp.allclose(out2, x2 * scale[0], atol=1e-6, rtol=1e-6)

    # Ragged (numel % 128 != 0): handled by the fused XLA fallback (no pad/slice).
    x3 = jax.random.normal(jax.random.PRNGKey(2), (3, 5, 7), dtype=jnp.float32)
    out3 = jax.block_until_ready(scale_layer(x3, scale, force_pallas=True))
    assert out3.shape == x3.shape and out3.dtype == x3.dtype
    assert jnp.allclose(out3, x3 * scale[0], atol=1e-6, rtol=1e-6)

    # Empty floating input preserves dtype (previous version promoted to f32).
    x_empty = jnp.zeros((0, 4), dtype=jnp.bfloat16)
    out_empty = scale_layer(x_empty, scale)
    assert out_empty.shape == x_empty.shape and out_empty.dtype == jnp.bfloat16

    # Integer input follows int*float promotion like PyTorch.
    x_int = jnp.arange(12, dtype=jnp.int32).reshape(3, 4)
    out_int = jax.block_until_ready(scale_layer(x_int, scale))
    assert out_int.dtype == jnp.float32
    assert jnp.allclose(out_int, x_int.astype(jnp.float32) * scale[0])

    print("KERNEL_OK")
</pallas_src>

<mosaic_0001>
module attributes {stable_mosaic.version = 11 : i64} {
  func.func @_scale_kernel(%arg0: i32, %arg1: memref<1xf32, #tpu.memory_space<smem>>, %arg2: memref<16x128xf32, #tpu.memory_space<vmem>>, %arg3: memref<16x128xf32, #tpu.memory_space<vmem>>) attributes {dimension_semantics = [#tpu.dimension_semantics<parallel>], iteration_bounds = array<i64: 1>, scalar_prefetch = 0 : i64, scratch_operands = 0 : i64, tpu.core_type = #tpu.core_type<tc>, window_params = [{transform_indices = @transform_0, window_bounds = array<i64: 1>}, {transform_indices = @transform_1, window_bounds = array<i64: 16, 128>}, {transform_indices = @transform_2, window_bounds = array<i64: 16, 128>}]} {
    %c0 = arith.constant 0 : index
    %c0_0 = arith.constant 0 : index
    %0 = vector.load %arg2[%c0, %c0_0] : memref<16x128xf32, #tpu.memory_space<vmem>>, vector<16x128xf32>
    %c0_1 = arith.constant 0 : index
    %1 = memref.load %arg1[%c0_1] : memref<1xf32, #tpu.memory_space<smem>>
    %2 = vector.broadcast %1 : f32 to vector<16x128xf32>
    %3 = arith.mulf %0, %2 : vector<16x128xf32>
    %c0_2 = arith.constant 0 : index
    %c0_3 = arith.constant 0 : index
    %4 = vector.load %arg3[%c0_2, %c0_3] : memref<16x128xf32, #tpu.memory_space<vmem>>, vector<16x128xf32>
    tpu.vector_store %arg3[%c0_2, %c0_3], %3 {strides = array<i32>} : memref<16x128xf32, #tpu.memory_space<vmem>>, vector<16x128xf32>,
    return
  }
  func.func @transform_0(%arg0: i32) -> i32 {
    %c0_i32 = arith.constant 0 : i32
    %c0_i32_0 = arith.constant 0 : i32
    return %c0_i32 : i32
  }
  func.func @transform_1(%arg0: i32) -> (i32, i32) {
    %c0_i32 = arith.constant 0 : i32
    %c0_i32_0 = arith.constant 0 : i32
    return %arg0, %c0_i32 : i32, i32
  }
  func.func @transform_2(%arg0: i32) -> (i32, i32) {
    %c0_i32 = arith.constant 0 : i32
    %c0_i32_0 = arith.constant 0 : i32
    return %arg0, %c0_i32 : i32, i32
  }
}

</mosaic_0001>

<bundles_post_ra>
// kernel: tpu_custom_call.1
= control target key start
LH: loop header
LB: loop body
LE: loop exit
PB: predicated region body
PF: predicated region fallthrough
CT: control target
= control target key end

     0   :  { %8 = vsyncpa [#allocation4], 0  ;;  %s128_s0 = inlined_call_operand.<no memory space> [shape: f32[1], index: 0, kind: input, shape index: {}]   ;;  %s129_s1 = inlined_call_operand.hbm [shape: f32[16,128], index: 1, kind: input, shape index: {}]   ;;  %s130_s2 = inlined_call_operand.hbm [shape: f32[16,128], index: 2, kind: output, shape index: {}]  }
   0x1   :  { %9 = vsyncpa [#allocation5], 0  ;;  %s100_s9 = smov [#allocation3]  }
   0x2   :  { %s17_s10 = sshll.u32 %s100_s9, 4  ;;  %s18_s10 = int_to_ptr.vmem [resolvable:$true] %s17_s10 }
   0x3   :  { %s64_s11 = scalar_lea.vmem %s18_s10, 256  ;;  %p69_p1 = scmp.lt.s32.totalorder %s18_s10, %s18_s10 }
   0x4   :  { %p65_p0 = scmp.ne.s32.totalorder %s18_s10, %s64_s11  ;;  %p70_p2 = scmp.lt.s32.totalorder %s64_s11, %s64_s11 }
   0x6   :  { %p71_p3 = por %p70_p2, %p69_p1 }
   0x8   :  { %p72_p4 = pnand %p71_p3, %p65_p0 }
   0xa   :  { %75 = shalt.err (!%p72_p4)
}
   0xb   :  { %s101_s12 = smov 128   ;;  %s102_s13 = smov 8  }
   0xc   :  { %23 = dma.hbm_to_vmem [thread:$0]  %s129_s1, 256, %s18_s10, [#allocation4], %s101_s12, %s101_s12, %s102_s13  }
   0xd   :  { %96 = dma.done.wait [#allocation4], 256  }
   0xe   :  { %97 = vsyncadd [#allocation4], 4294967040  ;;  %v30_v0 = vstv %s128_s0  ;;  %s103_s18 = smov [#allocation6]   ;;  %v27_v1 = vld [vmem:[#allocation3] sm:$0xff]  ;;  %v28_v2 = vld [vmem:[#allocation3 + $0x8] sm:$0xff] }
   0xf   :  { %s40_s19 = sshll.u32 %s103_s18, 4  ;;  %v31_v3 = vmul.f32 %v30_v0, %v27_v1  ;;  %v32_v4 = vmul.f32 %v30_v0, %v28_v2  ;;  %s41_s19 = int_to_ptr.vmem [resolvable:$true] %s40_s19 }
  0x10   :  { %s76_s20 = scalar_lea.vmem %s41_s19, 256  ;;  %p81_p6 = scmp.lt.s32.totalorder %s41_s19, %s41_s19 }
  0x11   :  { %33 = vst [vmem:[#allocation6] sm:$0xff] %v31_v3  ;;  %34 = vst [vmem:[#allocation6 + $0x8] sm:$0xff] %v32_v4  ;;  %p77_p5 = scmp.ne.s32.totalorder %s41_s19, %s76_s20  ;;  %p82_p7 = scmp.lt.s32.totalorder %s76_s20, %s76_s20 }
  0x13   :  { %p83_p8 = por %p82_p7, %p81_p6 }
  0x15   :  { %p84_p9 = pnand %p83_p8, %p77_p5 }
  0x17   :  { %87 = shalt.err (!%p84_p9)
}
  0x18   :  { %46 = dma.vmem_to_hbm [thread:$0]  %s41_s19, 256, %s130_s2, [#allocation5], %s101_s12, %s101_s12, %s102_s13  }
  0x19   :  { %98 = dma.done.wait [#allocation5], 256  }
  0x1a   :  { %99 = vsyncadd [#allocation5], 4294967040 }
  0x1b   :  { %50 = vsyncpa [#allocation4], 1 }
  0x1c   :  { %51 = vsyncpa [#allocation5], 1 }

</bundles_post_ra>
